<compile_context>
chip_gen: v5e
topology: v5e:2x2
jax: 0.10.0
libtpu: 0.0.40
codegen_flags: <defaults>
</compile_context>

<pallas_src>
import functools
import math
import numpy as np
import jax
import jax.numpy as jnp
from jax.experimental import pallas as pl
from jax.experimental.pallas import tpu as pltpu


# ----------------------------- filter setup -------------------------------- #
def generate_wavelet_filters(filter_type: str, pass_weight: float):
    if filter_type == "haar":
        lowpass = [pass_weight, pass_weight]
        highpass = [pass_weight, -pass_weight]
    elif filter_type == "db2":
        s3 = math.sqrt(3.0)
        nf = math.sqrt(2.0)
        lowpass = [
            (1 + s3) / 4 * pass_weight / nf,
            (3 + s3) / 4 * pass_weight / nf,
            (3 - s3) / 4 * pass_weight / nf,
            (1 - s3) / 4 * pass_weight / nf,
        ]
        highpass = [
            (1 - s3) / 4 * pass_weight / nf,
            -(3 - s3) / 4 * pass_weight / nf,
            (3 + s3) / 4 * pass_weight / nf,
            -(1 + s3) / 4 * pass_weight / nf,
        ]
    else:
        raise ValueError(f"Unknown filter type: {filter_type}")
    return lowpass, highpass


def build_conv_matrices(taps, S):
    """Matrices reproducing F.conv1d / F.conv_transpose1d (stride=1, groups=C,
    identical filter per channel) along the sequence axis, including zero
    padding and the length-(S-1) intermediate."""
    K = len(taps)
    pad = (K - 1) // 2
    Lc = S + 2 * pad - K + 1  # == S - 1 for haar and db2
    Wc = np.zeros((S, S), np.float32)
    for t in range(Lc):
        for k, w in enumerate(taps):
            j = t - pad + k
            if 0 <= j < S:
                Wc[t, j] += w
    Wt = np.zeros((S, S), np.float32)
    for s in range(S):
        for k, w in enumerate(taps):
            j = s + pad - k
            if 0 <= j < Lc:
                Wt[s, j] += w
    return Wc, Wt


def build_folded_operator(filter_type, pass_weight, S):
    """Host-side fold into the stacked-K operator (S, 2S):
         W2 = [ Wt_l@Wc_l + I  |  Wt_h@Wc_h ]
    so that  y = W2 @ [x ; beta2*x]  (beta2 commutes: it acts on H, W on S)."""
    lp, hp = generate_wavelet_filters(filter_type, pass_weight)
    wcl, wtl = build_conv_matrices(lp, S)
    wch, wth = build_conv_matrices(hp, S)
    a_low = wtl @ wcl + np.eye(S, dtype=np.float32)   # residual folded in
    a_high = wth @ wch
    return np.concatenate([a_low, a_high], axis=1).astype(np.float32)  # (S, 2S)


# ------------------------------ Pallas kernel ------------------------------ #
def _wavelet_kernel(x_ref, w_ref, p_ref, o_ref, *, mm_dtype, eps):
    tb, S, H = x_ref.shape

    # Hoisted (loop-invariant) loads / broadcasts.
    w = w_ref[...]                                    # (S, 2S) in matmul dtype
    params = p_ref[...]                               # (3, H)  f32
    beta2 = jnp.broadcast_to(params[0:1, :], (S, H))  # sqrt_beta**2 per channel
    gamma = params[1:2, :]                            # (1, H)
    bias = params[2:3, :]                             # (1, H)

    def body(b, carry):
        xb = x_ref[b]                                 # (S, H) input dtype
        x_lo = xb.astype(mm_dtype)
        x_hi = (xb * beta2).astype(mm_dtype)          # per-H scale commutes with S-convs
        xcat = jnp.concatenate([x_lo, x_hi], axis=0)  # (2S, H) stacked-K operand
        # One MXU matmul per sequence: (S,2S) @ (2S,H), f32 accumulate.
        y = jnp.dot(w, xcat, preferred_element_type=jnp.float32)  # (S, H) f32
        # LayerNorm over H (lanes); rsqrt goes to the EUP slot.
        mu = jnp.mean(y, axis=-1, keepdims=True)
        d = y - mu
        var = jnp.mean(d * d, axis=-1, keepdims=True)
        yn = d * jax.lax.rsqrt(var + eps)
        o_ref[b] = (yn * gamma + bias).astype(o_ref.dtype)
        return carry

    jax.lax.fori_loop(0, tb, body, 0)


def wavelet_transform(x, sqrt_beta, ln_gamma, ln_bias, *, filter_type, pass_weight,
                      eps=1e-12, matmul_dtype=None):
    B, S, H = x.shape
    x_dtype = x.dtype

    # MXU operand dtype: follow the input by default; bf16 can be forced for
    # throughput (f32 accumulation + f32 LayerNorm epilogue are kept).
    if matmul_dtype is None:
        matmul_dtype = jnp.bfloat16 if x_dtype == jnp.dtype(jnp.bfloat16) else jnp.float32
    mm_dtype = jnp.dtype(matmul_dtype)

    w = jnp.asarray(build_folded_operator(filter_type, pass_weight, S), dtype=mm_dtype)

    beta2 = (jnp.asarray(sqrt_beta, jnp.float32).reshape(-1) ** 2).reshape(1, H)
    gamma = jnp.asarray(ln_gamma, jnp.float32).reshape(1, H)
    bias = jnp.asarray(ln_bias, jnp.float32).reshape(1, H)
    params = jnp.concatenate([beta2, gamma, bias], axis=0)       # single (3, H) operand

    # ----- generation-aware block / VMEM sizing ----- #
    try:
        vmem_cap = int(pltpu.get_tpu_info().vmem_capacity_bytes)
    except Exception:
        vmem_cap = 64 * 1024 * 1024                               # safe v7x-sized fallback

    per_row_bytes = S * H * x_dtype.itemsize
    w_bytes = S * (2 * S) * mm_dtype.itemsize
    p_bytes = 3 * H * 4

    # Activation block target: ~1/8 of VMEM, clamped to [2 MiB, 16 MiB]
    # (big blocks amortize the ~0.35us/step overhead on v5e/v6e; modest on v7x).
    target_block_bytes = int(min(max(vmem_cap // 8, 2 << 20), 16 << 20))
    tb = int(max(1, min(B, target_block_bytes // max(per_row_bytes, 1))))
    # Shrink if the double-buffered working set (in+out blocks + W) won't fit.
    while tb > 1 and (4 * tb * per_row_bytes + 2 * w_bytes + (2 << 20)) > int(vmem_cap * 0.6):
        tb = max(1, tb // 2)
    # Keep >= 2 grid steps so the "parallel" batch axis can shard across the
    # two TensorCores on v7x (single-TC v5e/v6e unaffected).
    if B >= 2:
        tb = min(tb, -(-B // 2))

    n_steps = -(-B // tb)
    Bp = n_steps * tb
    x_in = jnp.pad(x, ((0, Bp - B), (0, 0), (0, 0))) if Bp != B else x

    blk_bytes = tb * per_row_bytes
    need = 4 * blk_bytes + 2 * (w_bytes + p_bytes) + (2 << 20)
    vmem_limit = int(min(max(need, min(96 << 20, (vmem_cap * 3) // 4)), max(need, vmem_cap)))

    kernel = functools.partial(_wavelet_kernel, mm_dtype=mm_dtype, eps=float(eps))

    out = pl.pallas_call(
        kernel,
        out_shape=jax.ShapeDtypeStruct((Bp, S, H), x_dtype),
        grid=(n_steps,),
        in_specs=[
            pl.BlockSpec((tb, S, H), lambda i: (i, 0, 0)),   # x batch block
            pl.BlockSpec((S, 2 * S), lambda i: (0, 0)),      # folded [A_low+I | A_high]
            pl.BlockSpec((3, H), lambda i: (0, 0)),          # packed beta2 / gamma / bias
        ],
        out_specs=pl.BlockSpec((tb, S, H), lambda i: (i, 0, 0)),
        compiler_params=pltpu.CompilerParams(
            dimension_semantics=("parallel",),
            vmem_limit_bytes=vmem_limit,
        ),
    )(x_in, w, params)

    return out[:B] if Bp != B else out


# ----------------------- pure-numpy reference (unfolded) -------------------- #
def reference(x, sqrt_beta, gamma, bias, *, filter_type, pass_weight):
    B, S, H = x.shape
    lp, hp = generate_wavelet_filters(filter_type, pass_weight)
    wcl, wtl = build_conv_matrices(lp, S)
    wch, wth = build_conv_matrices(hp, S)
    xf = np.asarray(x, np.float64)
    beta2 = (np.asarray(sqrt_beta, np.float64).reshape(-1) ** 2)[None, None, :]
    low = np.einsum("ts,bsh->bth", wcl, xf)
    high = np.einsum("ts,bsh->bth", wch, xf) * beta2
    rec = np.einsum("ts,bsh->bth", wtl, low) + np.einsum("ts,bsh->bth", wth, high)
    y = rec + xf
    u = y.mean(-1, keepdims=True)
    v = ((y - u) ** 2).mean(-1, keepdims=True)
    yn = (y - u) / np.sqrt(v + 1e-12)
    return yn * np.asarray(gamma, np.float64) + np.asarray(bias, np.float64)


# ---------------------------------- demo ----------------------------------- #
if __name__ == "__main__":
    pass_weight = 1.0 / math.sqrt(2.0)   # args.pass_weight
    S, H = 16, 32

    key = jax.random.PRNGKey(0)
    kx, kb = jax.random.split(key)
    sqrt_beta = jax.random.normal(kb, (1, H, 1), dtype=jnp.float32)  # like torch.randn(1,H,1)
    ln_gamma = jnp.ones((H,), dtype=jnp.float32)
    ln_bias = jnp.zeros((H,), dtype=jnp.float32)

    # Exact (f32-MXU) path: both filter types, even and odd batch (odd batch
    # exercises the host-side padding + 2-step grid).
    for ftype in ("db2", "haar"):
        for B in (2, 3):
            xt = jax.random.normal(jax.random.PRNGKey(B), (B, S, H), dtype=jnp.float32)
            out = wavelet_transform(xt, sqrt_beta, ln_gamma, ln_bias,
                                    filter_type=ftype, pass_weight=pass_weight)
            out = jax.block_until_ready(out)
            assert out.shape == (B, S, H)
            assert out.dtype == xt.dtype
            assert bool(jnp.all(jnp.isfinite(out)))
            ref = reference(np.asarray(xt), np.asarray(sqrt_beta), np.asarray(ln_gamma),
                            np.asarray(ln_bias), filter_type=ftype, pass_weight=pass_weight)
            np.testing.assert_allclose(np.asarray(out, np.float64), ref,
                                       rtol=1e-2, atol=1e-2)

    # bf16-MXU fast path (perf-review suggestion): check it runs and stays
    # close to the exact path.
    x = jax.random.normal(kx, (2, S, H), dtype=jnp.float32)
    out_f32 = wavelet_transform(x, sqrt_beta, ln_gamma, ln_bias,
                                filter_type="db2", pass_weight=pass_weight)
    out_bf16 = wavelet_transform(x, sqrt_beta, ln_gamma, ln_bias,
                                 filter_type="db2", pass_weight=pass_weight,
                                 matmul_dtype=jnp.bfloat16)
    out_bf16 = jax.block_until_ready(out_bf16)
    assert bool(jnp.all(jnp.isfinite(out_bf16)))
    err = jnp.abs(out_bf16.astype(jnp.float32) - out_f32.astype(jnp.float32))
    assert float(jnp.mean(err)) < 5e-2
    assert float(jnp.max(err)) < 3e-1

    print("KERNEL_OK")
</pallas_src>

<mosaic_0001>
module attributes {stable_mosaic.version = 11 : i64} {
  func.func @_wavelet_kernel(%arg0: i32, %arg1: memref<1x16x32xf32, #tpu.memory_space<vmem>>, %arg2: memref<16x32xf32, #tpu.memory_space<vmem>>, %arg3: memref<3x32xf32, #tpu.memory_space<vmem>>, %arg4: memref<1x16x32xf32, #tpu.memory_space<vmem>>) attributes {dimension_semantics = [#tpu.dimension_semantics<parallel>], iteration_bounds = array<i64: 2>, scalar_prefetch = 0 : i64, scratch_operands = 0 : i64, tpu.core_type = #tpu.core_type<tc>, window_params = [{transform_indices = @transform_0, window_bounds = array<i64: 1, 16, 32>}, {pipeline_mode = #tpu.pipeline_mode<synchronous>, transform_indices = @transform_1, window_bounds = array<i64: 16, 32>}, {pipeline_mode = #tpu.pipeline_mode<synchronous>, transform_indices = @transform_2, window_bounds = array<i64: 3, 32>}, {transform_indices = @transform_3, window_bounds = array<i64: 1, 16, 32>}]} {
    %c0 = arith.constant 0 : index
    %c0_0 = arith.constant 0 : index
    %0 = vector.load %arg2[%c0, %c0_0] : memref<16x32xf32, #tpu.memory_space<vmem>>, vector<16x32xf32>
    %c0_1 = arith.constant 0 : index
    %c0_2 = arith.constant 0 : index
    %1 = vector.load %arg3[%c0_1, %c0_2] : memref<3x32xf32, #tpu.memory_space<vmem>>, vector<3x32xf32>
    %2 = vector.extract_strided_slice %1 {offsets = [0, 0], sizes = [1, 32], strides = [1, 1]} : vector<3x32xf32> to vector<1x32xf32>
    %3 = vector.shape_cast %2 : vector<1x32xf32> to vector<1x32xf32>
    %4 = vector.broadcast %3 : vector<1x32xf32> to vector<16x32xf32>
    %5 = vector.extract_strided_slice %1 {offsets = [1, 0], sizes = [1, 32], strides = [1, 1]} : vector<3x32xf32> to vector<1x32xf32>
    %6 = vector.extract_strided_slice %1 {offsets = [2, 0], sizes = [1, 32], strides = [1, 1]} : vector<3x32xf32> to vector<1x32xf32>
    %c0_i32 = arith.constant 0 : i32
    %7 = arith.index_cast %c0_i32 : i32 to index
    %c0_3 = arith.constant 0 : index
    %c0_4 = arith.constant 0 : index
    %8 = vector.load %arg1[%7, %c0_3, %c0_4] : memref<1x16x32xf32, #tpu.memory_space<vmem>>, vector<1x16x32xf32>
    %9 = vector.shape_cast %8 : vector<1x16x32xf32> to vector<16x32xf32>
    %10 = arith.mulf %9, %4 : vector<16x32xf32>
    %11 = tpu.concatenate %9, %10 in 0 : vector<16x32xf32>, vector<16x32xf32> -> vector<32x32xf32>
    %cst = arith.constant dense<0.000000e+00> : vector<16x32xf32>
    %12 = tpu.matmul %0, %11, %cst {dimension_numbers = #tpu.dot_dimension_numbers<[1], [0], [0], [1], [0, 0, 1, 1], [], []>} : vector<16x32xf32>, vector<32x32xf32>, vector<16x32xf32> -> vector<16x32xf32>
    %cst_5 = arith.constant dense<0.000000e+00> : vector<16xf32>
    %13 = vector.multi_reduction <add>, %12, %cst_5 [1] : vector<16x32xf32> to vector<16xf32>
    %14 = vector.shape_cast %13 : vector<16xf32> to vector<16x1xf32>
    %cst_6 = arith.constant 3.200000e+01 : f32
    %15 = vector.broadcast %cst_6 : f32 to vector<16x1xf32>
    %16 = arith.divf %14, %15 : vector<16x1xf32>
    %17 = vector.broadcast %16 : vector<16x1xf32> to vector<16x32xf32>
    %18 = arith.subf %12, %17 : vector<16x32xf32>
    %19 = arith.mulf %18, %18 : vector<16x32xf32>
    %cst_7 = arith.constant dense<0.000000e+00> : vector<16xf32>
    %20 = vector.multi_reduction <add>, %19, %cst_7 [1] : vector<16x32xf32> to vector<16xf32>
    %21 = vector.shape_cast %20 : vector<16xf32> to vector<16x1xf32>
    %cst_8 = arith.constant 3.200000e+01 : f32
    %22 = vector.broadcast %cst_8 : f32 to vector<16x1xf32>
    %23 = arith.divf %21, %22 : vector<16x1xf32>
    %cst_9 = arith.constant 9.99999996E-13 : f32
    %24 = vector.broadcast %cst_9 : f32 to vector<16x1xf32>
    %25 = arith.addf %23, %24 : vector<16x1xf32>
    %26 = math.rsqrt %25 : vector<16x1xf32>
    %27 = vector.broadcast %26 : vector<16x1xf32> to vector<16x32xf32>
    %28 = arith.mulf %18, %27 : vector<16x32xf32>
    %29 = vector.broadcast %5 : vector<1x32xf32> to vector<16x32xf32>
    %30 = arith.mulf %28, %29 : vector<16x32xf32>
    %31 = vector.broadcast %6 : vector<1x32xf32> to vector<16x32xf32>
    %32 = arith.addf %30, %31 : vector<16x32xf32>
    %33 = arith.index_cast %c0_i32 : i32 to index
    %c0_10 = arith.constant 0 : index
    %c0_11 = arith.constant 0 : index
    %34 = vector.load %arg4[%33, %c0_10, %c0_11] : memref<1x16x32xf32, #tpu.memory_space<vmem>>, vector<1x16x32xf32>
    %35 = vector.shape_cast %34 : vector<1x16x32xf32> to vector<16x32xf32>
    %36 = vector.shape_cast %32 : vector<16x32xf32> to vector<1x16x32xf32>
    tpu.vector_store %arg4[%33, %c0_10, %c0_11], %36 {strides = array<i32>} : memref<1x16x32xf32, #tpu.memory_space<vmem>>, vector<1x16x32xf32>,
    %c1_i32 = arith.constant 1 : i32
    return
  }
  func.func @transform_0(%arg0: i32) -> (i32, i32, i32) {
    %c0_i32 = arith.constant 0 : i32
    %c0_i32_0 = arith.constant 0 : i32
    %c0_i32_1 = arith.constant 0 : i32
    return %arg0, %c0_i32, %c0_i32_0 : i32, i32, i32
  }
  func.func @transform_1(%arg0: i32) -> (i32, i32) {
    %c0_i32 = arith.constant 0 : i32
    %c0_i32_0 = arith.constant 0 : i32
    %c0_i32_1 = arith.constant 0 : i32
    return %c0_i32, %c0_i32_0 : i32, i32
  }
  func.func @transform_2(%arg0: i32) -> (i32, i32) {
    %c0_i32 = arith.constant 0 : i32
    %c0_i32_0 = arith.constant 0 : i32
    %c0_i32_1 = arith.constant 0 : i32
    return %c0_i32, %c0_i32_0 : i32, i32
  }
  func.func @transform_3(%arg0: i32) -> (i32, i32, i32) {
    %c0_i32 = arith.constant 0 : i32
    %c0_i32_0 = arith.constant 0 : i32
    %c0_i32_1 = arith.constant 0 : i32
    return %arg0, %c0_i32, %c0_i32_0 : i32, i32, i32
  }
}

</mosaic_0001>

<bundles_post_ra>
// kernel: tpu_custom_call.1
= control target key start
LH: loop header
LB: loop body
LE: loop exit
PB: predicated region body
PF: predicated region fallthrough
CT: control target
= control target key end

     0   :  { %8 = vsyncpa [#allocation3], 0  ;;  %s884_s0 = inlined_call_operand.hbm [shape: f32[2,16,32], index: 0, kind: input, shape index: {}]   ;;  %s885_s1 = inlined_call_operand.hbm [shape: f32[16,32], index: 1, kind: input, shape index: {}]   ;;  %s886_s2 = inlined_call_operand.hbm [shape: f32[3,32], index: 2, kind: input, shape index: {}]   ;;  %s887_s3 = inlined_call_operand.hbm [shape: f32[2,16,32], index: 3, kind: output, shape index: {}]  }
   0x1   :  { %10 = vsyncpa [#allocation3 + $0x1], 0 }
   0x2   :  { %11 = vsyncpa [#allocation6], 0 }
   0x3   :  { %12 = vsyncpa [#allocation4], 0 }
   0x4   :  { %14 = vsyncpa [#allocation4 + $0x1], 0  ;;  %s720_s12 = smov 0   ;;  %s722_s13 = smov 0  }
   0x5   :  { %s724_s14 = smov 0   ;;  %s726_s15 = smov 0  }
   0x6 LB: > { %s741_s16 = sadd.s32 4294967295, %s691_s15   ;;  %s427_s17 = sadd.s32 4294967294, %s691_s15   ;;  %s691_s15 = sphi %s726_s15, %s897_s15   ;;  %s687_s14 = sphi %s724_s14, %s896_s14   ;;  %s683_s13 = sphi %s722_s13, %s895_s13   ;;  %s679_s12 = sphi %s720_s12, %s894_s12  }
   0x7   : > { %p40_p0 = scmp.ne.s32.totalorder %s683_s13, %s679_s12  ;;  %p41_p1 = scmp.eq.s32.totalorder %s741_s16, 0 }
   0x8   : > { %p106_p2 = scmp.eq.s32.totalorder %s741_s16, 1  ;;  %p112_p3 = scmp.eq.s32.totalorder %s427_s17, 1 }
   0x9   : > { %p750_p4 = por %p41_p1, %p40_p0  ;;  %p428_p5 = scmp.ge.s32.totalorder %s691_s15, 1 }
   0xa   : > { %p755_p6 = por %p112_p3, %p40_p0  ;;  %p119_p7 = scmp.lt.s32.totalorder %s691_s15, 3 }
   0xb   : > { %s130_s22 = sshll.u32 %s885_s1, 4  ;;  %s693_s24 = smov [#allocation5]   ;;  %s131_s22 = int_to_ptr.hbm [resolvable:$true] %s130_s22 }
   0xc   : > { %p763_p8 = pnand %p428_p5, %p119_p7  ;;  %s132_s25 = sshll.u32 %s693_s24, 4  ;;  %s133_s25 = int_to_ptr.vmem [resolvable:$true] %s132_s25 }
   0xd   : > { %s145_s28 = sshll.u32 %s886_s2, 4  ;;  %s694_s29 = smov 128   ;;  %s146_s28 = int_to_ptr.hbm [resolvable:$true] %s145_s28 }
   0xe   : > { %p465_p9 = pneg %p763_p8  ;;  %s695_s30 = smov 8  }
   0xf   : > { %s696_s4 = smov [#allocation7]   ;;  %s779_s6 = sadd.s32 1, %s691_s15  }
  0x10   : > { %p466_p10 = pnand %p465_p9, %p41_p1  ;;  %s147_s5 = sshll.u32 %s696_s4, 4  ;;  %s148_s5 = int_to_ptr.vmem [resolvable:$true] %s147_s5 }
  0x11   : > { %s27_s7 = sadd.s32 1, %s687_s14  ;;  %s24_s8 = ssub.s32 %s691_s15, %s779_s6 }
  0x12   : > { %468 = dma.hbm_to_vmem [thread:$0]  (!%p466_p10), %s131_s22, 256, %s133_s25, [#allocation6], %s694_s29, %s694_s29, %s695_s30  }
  0x13   : > { %471 = dma.hbm_to_vmem [thread:$0]  (!%p466_p10), %s146_s28, 64, %s148_s5, [#allocation6]  }
  0x14   : > { %p34_p12 = scmp.ne.s32.totalorder %s687_s14, %s683_s13  ;;  %p25_p13 = scmp.eq.s32.totalorder %s24_s8, 0 }
  0x15   : > { %p35_p0 = scmp.eq.s32.totalorder %s691_s15, 0  ;;  %p482_p5 = scmp.lt.s32.totalorder %s691_s15, 2 }
  0x16   : > { %p789_p3 = por %p106_p2, %p34_p12  ;;  %s158_s11 = sand.u32 1, %s687_s14  }
  0x17   : > { %s795_s10 = scalar_select %p25_p13, %s687_s14, %s27_s7  }
  0x18   : > { %p36_p7 = por %p35_p0, %p34_p12  ;;  %s432_s17 = sshll.u32 %s158_s11, 4 }
  0x19   : > { %s447_s20 = sshll.u32 %s691_s15, 4  ;;  %s162_s25 = scalar_lea.vmem [#allocation2], %s432_s17 }
  0x1a   : > { %s167_s24 = scalar_lea.hbm %s884_s0, %s447_s20  ;;  %s170_s26 = sshll.u32 %s162_s25, 4  ;;  %s171_s26 = int_to_ptr.vmem [resolvable:$true] %s170_s26 }
  0x1b   : > { %s168_s27 = sshll.u32 %s167_s24, 4  ;;  %p802_p2 = pnand %p482_p5, %p36_p7  ;;  %s169_s27 = int_to_ptr.hbm [resolvable:$true] %s168_s27 }
  0x1c   : > { %s159_s4 = scalar_lea.sflag [#allocation3], %s158_s11  ;;  %s591_s5 = sshra.s32 %s169_s27, 4  ;;  %s592_s5 = int_to_ptr.hbm [resolvable:$true] %s591_s5 }
  0x1d   : > { %s593_s7 = scalar_lea.hbm %s592_s5, 16  ;;  %p595_p10 = pneg %p802_p2 }
  0x1e   : > { %p594_p9 = scmp.ne.s32.totalorder %s592_s5, %s593_s7  ;;  %s598_s20 = scalar_lea.hbm %s884_s0, 32 }
  0x1f   : > { %p599_p0 = scmp.lt.s32.totalorder %s592_s5, %s884_s0  ;;  %p600_p5 = scmp.lt.s32.totalorder %s598_s20, %s593_s7 }
  0x20   : > { %p596_p12 = pnand %p595_p10, %p594_p9 }
  0x21   : > { %p601_p7 = por %p600_p5, %p599_p0 }
  0x22   : > { %p597_p13 = pneg %p596_p12 }
  0x24   : > { %p602_p11 = pnand %p601_p7, %p597_p13 }
  0x26   : > { %605 = shalt.err (!%p602_p11)
}
  0x27   : > { %475 = dma.hbm_to_vmem [thread:$0]  (!%p802_p2), %s169_s27, 256, %s171_s26, %s159_s4, %s694_s29, %s694_s29, %s695_s30  }
  0x28   : > { %182 = sbr.rel (%p763_p8) target bundleno = 466 (0x1d2), region = 32  ;;  %s822_s11 = sand.u32 (!%p763_p8), 1, %s683_s13  }
  0x29   : > { %s436_s24 = sshll.u32 (!%p763_p8), %s822_s11, 4  ;;  %s185_s25 = scalar_lea.sflag (!%p763_p8), [#allocation3], %s822_s11 }
  0x2a   : > { %s188_s5 = scalar_lea.vmem (!%p763_p8), [#allocation2], %s436_s24 }
  0x2d   : > { %666 = dma.done.wait (%p750_p4), %s185_s25, 256  }
  0x2e   : > { %668 = vsyncadd (%p750_p4), %s185_s25, 4294967040 }
  0x2f   : > { %670 = dma.done.wait (%p41_p1), [#allocation6], 320  }
  0x30   : > { %672 = vsyncadd (%p41_p1), [#allocation6], 4294966976  ;;  %v836_v0 = vld [vmem:[#allocation7] sm:$0x7]  ;;  %v227_v1 = vld [vmem:[%s188_s5 + $0x8] sm:$0xff]  ;;  %vm230_vm0 = vcmask 261120  }
  0x31   : > { %v226_v2 = vld [vmem:[%s188_s5] sm:$0xff]  ;;  %v225_v3 = vperm.slane %v836_v0, 0  ;;  %v223_v7 = vld [vmem:[#allocation5 + $0x8] sm:$0xff]  ;;  %v697_v12 = vmov 32.0   ;;  %v311_v43 = vperm.slane %v836_v0, 1  ;;  %v314_v46 = vperm.slane %v836_v0, 2 }
  0x32   : > { %v222_v6 = vld [vmem:[#allocation5] sm:$0xff]  ;;  %525 = vrcp.f32 %v697_v12  ;;  %s448_s18 = sshll.u32 %s741_s16, 4  ;;  %s221_s26 = scalar_lea.vmem [#allocation8], %s436_s24 }
  0x33   : > { %v229_v4 = vmul.f32 %v227_v1, %v225_v3  ;;  %v228_v5 = vmul.f32 %v226_v2, %v225_v3  ;;  %s331_s30 = scalar_lea.hbm %s887_s3, %s448_s18  ;;  %s332_s27 = sshll.u32 %s221_s26, 4  ;;  %s333_s27 = int_to_ptr.vmem [resolvable:$true] %s332_s27 }
  0x34   : > { %s334_s16 = sshll.u32 %s331_s30, 4  ;;  %s320_s28 = scalar_lea.sflag [#allocation4], %s822_s11  ;;  %s335_s16 = int_to_ptr.hbm [resolvable:$true] %s334_s16 }
  0x35   : > { %249 = vmatpush.msra.mxu0 %v229_v4  ;;  %449 = vmatpush.msra.mxu1 %v229_v4  ;;  %s635_s4 = sshra.s32 %s335_s16, 4  ;;  %s641_s20 = scalar_lea.hbm %s887_s3, 32  ;;  %s636_s4 = int_to_ptr.hbm [resolvable:$true] %s635_s4 }
  0x36   : > { %s637_s7 = scalar_lea.hbm %s636_s4, 16  ;;  %p642_p11 = scmp.lt.s32.totalorder %s636_s4, %s887_s3 }
  0x37   : > { %250 = vmatpush.msra.mxu0 %v228_v5  ;;  %450 = vmatpush.msra.mxu1 %v228_v5  ;;  %p638_p1 = scmp.ne.s32.totalorder %s636_s4, %s637_s7  ;;  %p643_p2 = scmp.lt.s32.totalorder %s641_s20, %s637_s7 }
  0x38   : > { %v526_v13 = vpop.eup %525 }
  0x39   : > { %251 = vmatpush.msra.mxu0 %v227_v1  ;;  %451 = vmatpush.msra.mxu1 %v227_v1  ;;  %v267_v14 = vmul.f32 32.0, %v526_v13  ;;  %vm271_vm1 = vweird.f32 %v526_v13  ;;  %p639_p4 = pnand %p638_p1, %p789_p3  ;;  %p644_p9 = por %p643_p2, %p642_p11 }
  0x3b   : > { %252 = vmatpush.msra.mxu0 %v226_v2  ;;  %452 = vmatpush.msra.mxu1 %v226_v2  ;;  %v268_v15 = vsub.f32 1.0, %v267_v14  ;;  %p640_p8 = pneg %p639_p4 }
  0x3c   : > { %440 = vmatmul.msk.f32.vlgmr.msra.gmra.mxu0 %vm230_vm0, %v222_v6  ;;  %441 = vmatmul.msk.f32.vlgmr.msra.gmra.mxu1 %vm230_vm0, %v223_v7 }
  0x3d   : > { %v269_v16 = vmul.f32 %v526_v13, %v268_v15  ;;  %p645_p10 = pnand %p644_p9, %p640_p8 }
  0x3f   : > { %v270_v17 = vadd.f32 %v526_v13, %v269_v16 }
  0x41   : > { %v272_v18 = vsel %vm271_vm1, %v526_v13, %v270_v17 }
  0xb9   : > { %v254_v8 = vpop.f32.mrf.mxu0  ;;  %v257_v10 = vpop.f32.mrf.mxu1 }
  0xba   : > { %v260_v9 = vsel %vm230_vm0, %v254_v8, 0.0  ;;  %v263_v11 = vsel %vm230_vm0, %v257_v10, 0.0 }
  0xbb   : > { %261 = vadd.xlane.f32.xlu0 %v260_v9 }
  0xc3   : > { %264 = vadd.xlane.f32.xlu0 %v263_v11 }
 0x12e   : > { %v262_v19 = vpop.xlane.xlu0 %261 }
 0x12f   : > { %v273_v20 = vmul.f32 %v272_v18, %v262_v19 }
 0x131   : > { %v275_v21 = vsub.f32 %v254_v8, %v273_v20 }
 0x133   : > { %v277_v22 = vmul.f32 %v275_v21, %v275_v21 }
 0x135   : > { %v279_v23 = vsel %vm230_vm0, %v277_v22, 0.0 }
 0x136   : > { %280 = vadd.xlane.f32.xlu1 %v279_v23  ;;  %v265_v24 = vpop.xlane.xlu0 %264 }
 0x137   : > { %v274_v25 = vmul.f32 %v272_v18, %v265_v24 }
 0x139   : > { %v276_v26 = vsub.f32 %v257_v10, %v274_v25 }
 0x13b   : > { %v278_v27 = vmul.f32 %v276_v26, %v276_v26 }
 0x13d   : > { %v282_v28 = vsel %vm230_vm0, %v278_v27, 0.0 }
 0x13e   : > { %283 = vadd.xlane.f32.xlu1 %v282_v28 }
 0x1a9   : > { %v281_v29 = vpop.xlane.xlu1 %280 }
 0x1aa   : > { %v285_v30 = vmul.f32 %v281_v29, %v272_v18 }
 0x1ac   : > { %v287_v31 = vadd.f32 1e-12, %v285_v30 }
 0x1ae   : > { %527 = vrsqrt.f32 %v287_v31  ;;  %vm295_vm3 = vweird.f32 %v287_v31 }
 0x1b1   : > { %v284_v32 = vpop.xlane.xlu1 %283 }
 0x1b2   : > { %v286_v33 = vmul.f32 %v284_v32, %v272_v18 }
 0x1b4   : > { %v528_v34 = vpop.eup %527  ;;  %v288_v35 = vadd.f32 1e-12, %v286_v33 }
 0x1b5   : > { %v290_v36 = vmul.f32 %v528_v34, %v287_v31  ;;  %vm296_vm2 = vweird.f32 %v528_v34 }
 0x1b6   : > { %529 = vrsqrt.f32 %v288_v35  ;;  %vm297_vm4 = vmor %vm295_vm3, %vm296_vm2  ;;  %vm305_vm6 = vweird.f32 %v288_v35 }
 0x1b7   : > { %v291_v37 = vmul.f32 %v528_v34, %v290_v36 }
 0x1b9   : > { %v292_v38 = vmul.f32 0.5, %v291_v37 }
 0x1bb   : > { %v293_v39 = vsub.f32 1.5, %v292_v38 }
 0x1bc   : > { %v530_v40 = vpop.eup %529 }
 0x1bd   : > { %v294_v41 = vmul.f32 %v528_v34, %v293_v39  ;;  %v300_v42 = vmul.f32 %v530_v40, %v288_v35  ;;  %vm306_vm5 = vweird.f32 %v530_v40 }
 0x1be   : > { %vm307_vm7 = vmor %vm305_vm6, %vm306_vm5 }
 0x1bf   : > { %v298_v44 = vsel %vm297_vm4, %v528_v34, %v294_v41  ;;  %v301_v45 = vmul.f32 %v530_v40, %v300_v42 }
 0x1c0   : > { %v309_v47 = vmul.f32 %v298_v44, %v275_v21 }
 0x1c1   : > { %v302_v48 = vmul.f32 0.5, %v301_v45 }
 0x1c2   : > { %v312_v49 = vmul.f32 %v311_v43, %v309_v47 }
 0x1c3   : > { %v303_v50 = vsub.f32 1.5, %v302_v48 }
 0x1c4   : > { %v315_v51 = vadd.f32 %v314_v46, %v312_v49 }
 0x1c5   : > { %v304_v52 = vmul.f32 %v530_v40, %v303_v50 }
 0x1c6   : > { %317 = vst.msk [vmem:[%s221_s26] sm:$0xff] %vm230_vm0, %v315_v51 }
 0x1c7   : > { %v308_v53 = vsel %vm307_vm7, %v530_v40, %v304_v52 }
 0x1c8   : > { %v310_v54 = vmul.f32 %v308_v53, %v276_v26 }
 0x1ca   : > { %v313_v55 = vmul.f32 %v311_v43, %v310_v54 }
 0x1cc   : > { %v316_v56 = vadd.f32 %v314_v46, %v313_v55 }
 0x1ce   : > { %318 = vst.msk [vmem:[%s221_s26 + $0x8] sm:$0xff] %vm230_vm0, %v316_v56 }
 0x1cf   : > { %648 = shalt.err (!%p645_p10)
}
 0x1d0   : > { %s698_s11 = smov 128   ;;  %s699_s24 = smov 8  }
 0x1d1   : > { %463 = dma.vmem_to_hbm [thread:$0]  (%p789_p3), %s333_s27, 256, %s335_s16, %s320_s28, %s698_s11, %s698_s11, %s699_s24  }
 0x1d2 PF: > { %s349_s25 = sand.u32 1, %s679_s12   ;;  %p893_p12 = scmp.ge.s32.totalorder %s691_s15, 2 }
 0x1d3   : > { %s350_s5 = scalar_lea.sflag [#allocation4], %s349_s25 }
 0x1d4   : > { %p477_p13 = pnand %p893_p12, %p755_p6 }
 0x1d6   : > { %p478_p0 = pneg %p477_p13 }
 0x1d8   : > { %674 = dma.done.wait (%p478_p0), %s350_s5, 256  }
 0x1d9   : > { %676 = vsyncadd (%p478_p0), %s350_s5, 4294967040  ;;  %p17_p5 = scmp.ge.s32.totalorder %s779_s6, 4   ;;  %s894_s12 = smov %s683_s13 }
 0x1da   : > { %s895_s13 = smov %s687_s14  ;;  %s896_s14 = smov %s795_s10 }
 0x1db   : > { %s897_s15 = smov %s779_s6  ;;  %19 = sbr.rel (!%p17_p5) target bundleno = 6 (0x6), region = 85 }
 0x1e0   :  { %356 = vsyncpa [#allocation3], 1 }
 0x1e1   :  { %358 = vsyncpa [#allocation3 + $0x1], 1 }
 0x1e2   :  { %359 = vsyncpa [#allocation6], 1 }
 0x1e3   :  { %360 = vsyncpa [#allocation4], 1 }
 0x1e4   :  { %362 = vsyncpa [#allocation4 + $0x1], 1 }

</bundles_post_ra>
